<compile_context>
chip_gen: v7x
topology: tpu7x:2x2x1
jax: 0.10.0
libtpu: 0.0.40
codegen_flags: <defaults>
</compile_context>

<pallas_src>
import functools

import jax
import jax.numpy as jnp
from jax import lax
from jax.experimental import pallas as pl
from jax.experimental.pallas import tpu as pltpu


def _round_up(x, m):
    return (x + m - 1) // m * m


def _conv_mm_bias_relu_kernel(w_ref, b_ref, p_ref, o_ref):
    """Pure matmul + bias + ReLU on pre-extracted im2col patches.

    w_ref : (Cpad, Kpad)   weight-normalized conv weight, transposed + padded
    b_ref : (Cpad, 1)      conv bias (f32; padded channel rows are zero)
    p_ref : (1, Kpad, TM)  im2col patches: K on sublanes, spatial on lanes
    o_ref : (1, Cpad, TM)  channel-major output tile (lane-dense store)
    """
    acc = jnp.dot(w_ref[...], p_ref[0],
                  preferred_element_type=jnp.float32)        # MXU, (Cpad, TM)
    acc = jnp.maximum(acc + b_ref[...], 0.0)                 # bias + ReLU (VPU)
    o_ref[0] = acc.astype(o_ref.dtype)


@functools.partial(jax.jit,
                   static_argnames=("stride", "padding", "compute_dtype"))
def basic_conv2d_pallas(x_nchw, v, g, b, *, stride=(1, 1), padding=(0, 0),
                        compute_dtype=jnp.float32):
    """Weight-normalized Conv2d + ReLU (PyTorch BasicConv2d forward).

    x_nchw : (N, Cin, H, W)       float32 (NCHW, PyTorch convention)
    v      : (Cout, Cin, KH, KW)  weight_norm 'v' parameter
    g      : (Cout,)              weight_norm 'g' parameter
    b      : (Cout,)              conv bias
    """
    n, cin, h, w = x_nchw.shape
    cout, _, kh, kw = v.shape
    sh, sw = stride
    ph, pw = padding

    # --- weight norm (PyTorch default dim=0): per-output-channel L2 norm ----
    v32 = v.astype(jnp.float32)
    v_norm = jnp.sqrt(jnp.sum(v32 ** 2, axis=(1, 2, 3), keepdims=True))
    w_oihw = (g.astype(jnp.float32).reshape(cout, 1, 1, 1) / v_norm) * v32

    # --- geometry ------------------------------------------------------------
    hp, wp = h + 2 * ph, w + 2 * pw
    oh = (hp - kh) // sh + 1
    ow = (wp - kw) // sw + 1
    m = oh * ow                    # flattened spatial output
    k = cin * kh * kw              # contraction size

    kpad = _round_up(k, 8)         # sublane multiple
    mpad = _round_up(m, 128)       # lane multiple (dense stores)
    cpad = _round_up(cout, 8)      # sublane multiple

    # Flattened weight (Cout, K) with K ordered (Cin, KH, KW) to match the
    # im2col order below; pad to (Cpad, Kpad).  Padded rows/cols are zero.
    w_flat = w_oihw.reshape(cout, k)
    w_ext = jnp.zeros((cpad, kpad), jnp.float32).at[:cout, :k].set(w_flat)
    w_ext = w_ext.astype(compute_dtype)
    b_ext = jnp.zeros((cpad, 1), jnp.float32).at[:cout, 0].set(
        b.astype(jnp.float32))

    # --- im2col in the wrapper (fused by jit with the pallas_call) ----------
    # K order: (Cin, KH, KW) — matches w_oihw.reshape(cout, k) above.
    x_p = jnp.pad(x_nchw.astype(jnp.float32),
                  ((0, 0), (0, 0), (ph, ph), (pw, pw)))
    slabs = []
    for ki in range(kh):
        for kj in range(kw):
            slabs.append(x_p[:, :,
                             ki:ki + (oh - 1) * sh + 1:sh,
                             kj:kj + (ow - 1) * sw + 1:sw])   # (N, Cin, OH, OW)
    patches = jnp.stack(slabs, axis=2)                        # (N,Cin,KH*KW,OH,OW)
    patches = patches.reshape(n, k, m)
    patches = jnp.pad(patches, ((0, 0), (0, kpad - k), (0, mpad - m)))
    patches = patches.astype(compute_dtype)

    # M tile: whole (padded) spatial extent if small, else the largest
    # 128-multiple divisor of Mpad that is <= 2048 lanes.
    tile_m = mpad
    cap = 2048
    if mpad > cap:
        tile_m = 128
        for t in range(cap, 127, -128):
            if mpad % t == 0:
                tile_m = t
                break
    n_m = mpad // tile_m

    out_flat = pl.pallas_call(
        _conv_mm_bias_relu_kernel,
        out_shape=jax.ShapeDtypeStruct((n, cpad, mpad), x_nchw.dtype),
        grid_spec=pltpu.PrefetchScalarGridSpec(
            num_scalar_prefetch=0,
            grid=(n, n_m),
            in_specs=[
                # Weight / bias: constant block index -> DMA'd once, revisited.
                pl.BlockSpec((cpad, kpad), lambda i, t: (0, 0)),
                pl.BlockSpec((cpad, 1), lambda i, t: (0, 0)),
                # Patches: disjoint (batch, M-tile) blocks.
                pl.BlockSpec((1, kpad, tile_m), lambda i, t: (i, 0, t)),
            ],
            out_specs=pl.BlockSpec((1, cpad, tile_m), lambda i, t: (i, 0, t)),
        ),
        compiler_params=pltpu.CompilerParams(
            dimension_semantics=("parallel", "parallel")),
    )(w_ext, b_ext, patches)

    # (N, Cpad, Mpad) -> drop padding -> (N, Cout, OH, OW): already NCHW.
    return out_flat[:, :cout, :m].reshape(n, cout, oh, ow)


def _reference(x_nchw, v, g, b, *, stride, padding):
    cout = v.shape[0]
    v_norm = jnp.sqrt(jnp.sum(v ** 2, axis=(1, 2, 3), keepdims=True))
    w = (g.reshape(cout, 1, 1, 1) / v_norm) * v
    out = lax.conv_general_dilated(
        x_nchw, w, window_strides=stride,
        padding=[(padding[0], padding[0]), (padding[1], padding[1])],
        dimension_numbers=("NCHW", "OIHW", "NCHW"),
        precision=lax.Precision.HIGHEST)
    out = out + b.reshape(1, cout, 1, 1)
    return jnp.maximum(out, 0.0)


if __name__ == "__main__":
    # Module config: BasicConv2d(wn, in_channel=4, out_channel=8,
    #                            kernel_size=3, stride=1, padding=(1, 1))
    N, CIN, COUT, H, W = 2, 4, 8, 16, 16
    KH = KW = 3
    STRIDE = (1, 1)
    PADDING = (1, 1)

    key = jax.random.PRNGKey(0)
    kx, kv, kg, kb = jax.random.split(key, 4)
    x = jax.random.normal(kx, (N, CIN, H, W), dtype=jnp.float32)
    v = jax.random.normal(kv, (COUT, CIN, KH, KW), dtype=jnp.float32) * 0.1
    g = jax.random.normal(kg, (COUT,), dtype=jnp.float32) + 1.0
    b = jax.random.normal(kb, (COUT,), dtype=jnp.float32) * 0.05

    out = basic_conv2d_pallas(x, v, g, b, stride=STRIDE, padding=PADDING)
    out = jax.block_until_ready(out)

    ref = _reference(x, v, g, b, stride=STRIDE, padding=PADDING)
    assert out.shape == (N, COUT, H, W), out.shape
    max_err = float(jnp.max(jnp.abs(out - ref)))
    assert jnp.allclose(out, ref, atol=1e-2, rtol=1e-2), max_err

    print("KERNEL_OK")
</pallas_src>

<mosaic_0001>
module attributes {stable_mosaic.version = 11 : i64} {
  func.func @_conv_mm_bias_relu_kernel(%arg0: i32, %arg1: i32, %arg2: memref<8x40xf32, #tpu.memory_space<vmem>>, %arg3: memref<8x1xf32, #tpu.memory_space<vmem>>, %arg4: memref<1x40x256xf32, #tpu.memory_space<vmem>>, %arg5: memref<1x8x256xf32, #tpu.memory_space<vmem>>) attributes {dimension_semantics = [#tpu.dimension_semantics<parallel>, #tpu.dimension_semantics<parallel>], iteration_bounds = array<i64: 2, 1>, scalar_prefetch = 0 : i64, scratch_operands = 0 : i64, tpu.core_type = #tpu.core_type<tc>, window_params = [{pipeline_mode = #tpu.pipeline_mode<synchronous>, transform_indices = @transform_0, window_bounds = array<i64: 8, 40>}, {pipeline_mode = #tpu.pipeline_mode<synchronous>, transform_indices = @transform_1, window_bounds = array<i64: 8, 1>}, {transform_indices = @transform_2, window_bounds = array<i64: 1, 40, 256>}, {transform_indices = @transform_3, window_bounds = array<i64: 1, 8, 256>}]} {
    %c0 = arith.constant 0 : index
    %c0_0 = arith.constant 0 : index
    %0 = vector.load %arg2[%c0, %c0_0] : memref<8x40xf32, #tpu.memory_space<vmem>>, vector<8x40xf32>
    %c0_1 = arith.constant 0 : index
    %c0_2 = arith.constant 0 : index
    %c0_3 = arith.constant 0 : index
    %1 = vector.load %arg4[%c0_1, %c0_2, %c0_3] : memref<1x40x256xf32, #tpu.memory_space<vmem>>, vector<1x40x256xf32>
    %2 = vector.shape_cast %1 : vector<1x40x256xf32> to vector<40x256xf32>
    %cst = arith.constant dense<0.000000e+00> : vector<8x256xf32>
    %3 = tpu.matmul %0, %2, %cst {dimension_numbers = #tpu.dot_dimension_numbers<[1], [0], [0], [1], [0, 0, 1, 1], [], []>} : vector<8x40xf32>, vector<40x256xf32>, vector<8x256xf32> -> vector<8x256xf32>
    %c0_4 = arith.constant 0 : index
    %c0_5 = arith.constant 0 : index
    %4 = vector.load %arg3[%c0_4, %c0_5] : memref<8x1xf32, #tpu.memory_space<vmem>>, vector<8x1xf32>
    %5 = vector.broadcast %4 : vector<8x1xf32> to vector<8x256xf32>
    %6 = arith.addf %3, %5 : vector<8x256xf32>
    %cst_6 = arith.constant 0.000000e+00 : f32
    %7 = vector.broadcast %cst_6 : f32 to vector<8x256xf32>
    %8 = arith.maximumf %6, %7 : vector<8x256xf32>
    %c0_7 = arith.constant 0 : index
    %c0_8 = arith.constant 0 : index
    %c0_9 = arith.constant 0 : index
    %9 = vector.load %arg5[%c0_7, %c0_8, %c0_9] : memref<1x8x256xf32, #tpu.memory_space<vmem>>, vector<1x8x256xf32>
    %10 = vector.shape_cast %9 : vector<1x8x256xf32> to vector<8x256xf32>
    %11 = vector.shape_cast %8 : vector<8x256xf32> to vector<1x8x256xf32>
    tpu.vector_store %arg5[%c0_7, %c0_8, %c0_9], %11 {strides = array<i32>} : memref<1x8x256xf32, #tpu.memory_space<vmem>>, vector<1x8x256xf32>,
    return
  }
  func.func @transform_0(%arg0: i32, %arg1: i32) -> (i32, i32) {
    %c0_i32 = arith.constant 0 : i32
    %c0_i32_0 = arith.constant 0 : i32
    %c0_i32_1 = arith.constant 0 : i32
    return %c0_i32, %c0_i32_0 : i32, i32
  }
  func.func @transform_1(%arg0: i32, %arg1: i32) -> (i32, i32) {
    %c0_i32 = arith.constant 0 : i32
    %c0_i32_0 = arith.constant 0 : i32
    %c0_i32_1 = arith.constant 0 : i32
    return %c0_i32, %c0_i32_0 : i32, i32
  }
  func.func @transform_2(%arg0: i32, %arg1: i32) -> (i32, i32, i32) {
    %c0_i32 = arith.constant 0 : i32
    %c0_i32_0 = arith.constant 0 : i32
    return %arg0, %c0_i32, %arg1 : i32, i32, i32
  }
  func.func @transform_3(%arg0: i32, %arg1: i32) -> (i32, i32, i32) {
    %c0_i32 = arith.constant 0 : i32
    %c0_i32_0 = arith.constant 0 : i32
    return %arg0, %c0_i32, %arg1 : i32, i32, i32
  }
}

</mosaic_0001>

<bundles_post_ra>
// kernel: basic_conv2d_pallas.1
= control target key start
LH: loop header
LB: loop body
LE: loop exit
PB: predicated region body
PF: predicated region fallthrough
CT: control target
= control target key end

     0   :  { %s487_s12 = smov 0   ;;  %s489_s13 = smov 0   ;;  %s530_s0 = inlined_call_operand.vmem [shape: f32[8,40], index: 0, kind: input, shape index: {}]   ;;  %s531_s1 = inlined_call_operand.vmem [shape: f32[8,1], index: 1, kind: input, shape index: {}]   ;;  %s532_s2 = inlined_call_operand.vmem [shape: f32[2,40,256], index: 2, kind: input, shape index: {}]   ;;  %s533_s3 = inlined_call_operand.vmem [shape: f32[2,8,256], index: 3, kind: output, shape index: {}]  }
   0x1   :  { %s491_s14 = smov 0  }
   0x2 LB: > { %s25_s15 = sadd.s32 1, %s459_s13  ;;  %p397_p0 = scmp.ge.s32.totalorder %s463_s14, 1  ;;  %s463_s14 = sphi %s491_s14, %s13_s14   ;;  %s459_s13 = sphi %s489_s13, %s535_s13   ;;  %s455_s12 = sphi %s487_s12, %s534_s12  }
   0x3   : > { %p27_p1 = scmp.ge.s32.totalorder %s25_s15, 2  ;;  %p158_p2 = scmp.lt.s32.totalorder %s463_s14, 3 }
   0x5   : > { %s537_s15 = smov (%p27_p1, %s25_s15), 0  ;;  %p159_p3 = pnand %p397_p0, %p158_p2 }
   0x6   : > { %p191_p4 = scmp.lt.s32.totalorder (!%p159_p3), %s455_s12, 1  ;;  %v221_v0 = vld [vmem:[%s531_s1] sm:$0xff] (!%p159_p3)  ;;  %v465_v1 = vmov (!%p159_p3), 0.0   ;;  %v466_v2 = vmov (!%p159_p3), 0   ;;  %vm227_vm0 = vcmask (!%p159_p3), 326656  }
   0x7   : > { %162 = sbr.rel (%p159_p3) target bundleno = 249 (0xf9), region = 32  ;;  %295 = vmatprep.mubr.f32.mxu0 (!%p159_p3), %v465_v1  ;;  %440 = vset.pattern.permute.xlu0 (!%p159_p3), %v466_v2  ;;  %v210_v17 = vld [vmem:[%s530_s0] sm:$0xff] (!%p159_p3) }
   0x8   : > { %224 = vperm.xlu0 (!%p159_p3), %440, %v221_v0  }
   0xe   : > { %s539_s12 = smov (!%p191_p4, %s455_s12), 1 }
   0xf   : > { %s413_s18 = smul.u32 80, %s539_s12  ;;  %s404_s24 = sshll.u32 %s539_s12, 4 }
  0x10   : > { %s208_s27 = scalar_lea.vmem %s533_s3, %s404_s24 }
  0x11   : > { %s198_s21 = scalar_lea.vmem %s532_s2, %s413_s18 }
  0x12   : > { %v212_v3 = vld [vmem:[%s198_s21 + $0x8] sm:$0xff]  ;;  %v214_v4 = vld [vmem:[%s198_s21 + $0x18] sm:$0xff]  ;;  %v211_v5 = vld [vmem:[%s198_s21] sm:$0xff] }
  0x13   : > { %v405_v6 = vpack.c.bf16 %v214_v4, %v212_v3  ;;  %v213_v7 = vld [vmem:[%s198_s21 + $0x10] sm:$0xff]  ;;  %v216_v8 = vld [vmem:[%s198_s21 + $0x28] sm:$0xff]  ;;  %v218_v9 = vld [vmem:[%s198_s21 + $0x38] sm:$0xff] }
  0x14   : > { %v407_v10 = vpack.c.bf16 %v213_v7, %v211_v5  ;;  %v409_v11 = vpack.c.bf16 %v218_v9, %v216_v8  ;;  %v215_v12 = vld [vmem:[%s198_s21 + $0x20] sm:$0xff]  ;;  %v217_v13 = vld [vmem:[%s198_s21 + $0x30] sm:$0xff]  ;;  %v220_v15 = vld [vmem:[%s198_s21 + $0x48] sm:$0xff] }
  0x15   : > { %406 = vmatprep.subr.bf16.mxu0 %v405_v6  ;;  %v411_v14 = vpack.c.bf16 %v217_v13, %v215_v12  ;;  %v219_v16 = vld [vmem:[%s198_s21 + $0x40] sm:$0xff] }
  0x16   : > { %408 = vmatpush1.bf16.msra.mxu0 %v407_v10 }
  0x17   : > { %410 = vmatprep.subr.bf16.mxu0 %v409_v11 }
  0x1a   : > { %412 = vmatpush1.bf16.msra.mxu0 %v411_v14 }
  0x1b   : > { %239 = vmatprep.subr.mxu0 %v220_v15 }
  0x1e   : > { %240 = vmatpush1.msra.mxu0 %v219_v16 }
  0x1f   : > { %401 = vmatmul.mubr.msk.f32.vlgmr.msra.gmra.mrb[0].mxu0 %vm227_vm0, %v210_v17 }
  0x87   : > { %v225_v18 = vpop.permute.xlu0 %224 }
  0xf2   : > { %v297_v19 = vpop.f32.mrb[0].mxu0 }
  0xf3   : > { %v298_v20 = vadd.f32 %v297_v19, %v225_v18  ;;  %v299_v21 = vpop.f32.mrb[1].mxu0 }
  0xf4   : > { %v300_v22 = vadd.f32 %v299_v21, %v225_v18 }
  0xf5   : > { %v302_v23 = vmax.f32 %v298_v20, 0.0 }
  0xf6   : > { %v303_v24 = vmax.f32 %v300_v22, 0.0 }
  0xf7   : > { %304 = vst [vmem:[%s208_s27] sm:$0xff] %v302_v23 }
  0xf8   : > { %305 = vst [vmem:[%s208_s27 + $0x8] sm:$0xff] %v303_v24 }
  0xf9 PF: > { %s13_s14 = sadd.s32 1, %s463_s14   ;;  %s534_s12 = smov %s459_s13 }
  0xfa   : > { %p10_p5 = scmp.ge.s32.totalorder %s13_s14, 4   ;;  %s535_s13 = smov %s537_s15 }
  0xfc   :  { %12 = sbr.rel (!%p10_p5) target bundleno = 2 (0x2), region = 62 }

</bundles_post_ra>
